<compile_context>
chip_gen: v7x
topology: tpu7x:2x2x1
jax: 0.10.0
libtpu: 0.0.40
codegen_flags: <defaults>
</compile_context>

<pallas_src>
import functools

import jax
import jax.numpy as jnp
from jax.experimental import pallas as pl
from jax.experimental.pallas import tpu as pltpu


def _round_up(x, m):
    return (x + m - 1) // m * m


def _make_dropout_mask(key, shape, p):
    """Pre-scaled keep mask: 0 where dropped, 1/(1-p) where kept."""
    p = float(p)
    if p <= 0.0:
        return jnp.ones(shape, jnp.float32)
    if p >= 1.0:
        return jnp.zeros(shape, jnp.float32)
    keep = jax.random.uniform(key, shape, jnp.float32) > p
    return keep.astype(jnp.float32) * (1.0 / (1.0 - p))


def mlp_kernel(x_ref, w1_ref, b1_ref, w2_ref, b2_ref, w3_ref, b3_ref,
               *rest, training):
    # TODO(synk): masks are generated host-side via jax.random because
    # pltpu.prng_seed/prng_random_bits have no interpret/CPU lowering; on a
    # TPU-only deployment they could be drawn in-kernel to save HBM traffic.
    if training:
        m1_ref, m2_ref, o_ref = rest
    else:
        (o_ref,) = rest

    # lin1 + ReLU (+ dropout1): bf16 MXU operands, f32 accumulation.
    h1 = jnp.dot(x_ref[...], w1_ref[...], preferred_element_type=jnp.float32)
    h1 = jnp.maximum(h1 + b1_ref[...], 0.0)
    if training:
        h1 = h1 * m1_ref[...]          # mask already carries the 1/(1-p) scale

    # lin2 + ReLU (+ dropout2)
    h2 = jnp.dot(h1.astype(w2_ref.dtype), w2_ref[...],
                 preferred_element_type=jnp.float32)
    h2 = jnp.maximum(h2 + b2_ref[...], 0.0)
    if training:
        h2 = h2 * m2_ref[...]

    # lin3 (no activation); N is padded to a lane-dense 128.
    out = jnp.dot(h2.astype(w3_ref.dtype), w3_ref[...],
                  preferred_element_type=jnp.float32) + b3_ref[...]
    o_ref[...] = out.astype(o_ref.dtype)


def net_forward(x, params, *, num_inputs, dropout1, dropout2,
                is_training=True, seed=0):
    """Pallas implementation of Net.forward."""
    w1, b1, w2, b2, w3, b3 = params
    x2d = x.reshape((-1, num_inputs)).astype(jnp.float32)
    batch = x2d.shape[0]
    h1_dim, h2_dim, n_out = w1.shape[1], w2.shape[1], w3.shape[1]

    # --- lane-dense output: pad N up to a multiple of 128 with zero columns.
    n_pad = max(128, _round_up(n_out, 128))
    if n_pad != n_out:
        w3p = jnp.pad(w3, ((0, 0), (0, n_pad - n_out)))
        b3p = jnp.pad(b3, ((0, 0), (0, n_pad - n_out)))
    else:
        w3p, b3p = w3, b3

    # --- batch tile: multiple of 8 sublanes, capped at 256 rows (fills MXU M,
    #     keeps double-buffered tiles tiny vs. the 32 MiB VMEM budget).
    tb = min(256, _round_up(batch, 8))
    padded_batch = _round_up(batch, tb)
    if padded_batch != batch:
        x2d = jnp.pad(x2d, ((0, padded_batch - batch), (0, 0)))

    # --- bf16 MXU operands, f32 bias / ReLU / dropout / accumulation.
    xb = x2d.astype(jnp.bfloat16)
    w1b, w2b, w3b = (w.astype(jnp.bfloat16) for w in (w1, w2, w3p))
    b1f, b2f, b3f = (b.astype(jnp.float32) for b in (b1, b2, b3p))

    grid = (padded_batch // tb,)
    const = lambda i: (0, 0)   # weights/biases resident across grid steps
    row = lambda i: (i, 0)     # batch-tiled arrays

    in_specs = [
        pl.BlockSpec((tb, xb.shape[1]), row),
        pl.BlockSpec(w1b.shape, const), pl.BlockSpec(b1f.shape, const),
        pl.BlockSpec(w2b.shape, const), pl.BlockSpec(b2f.shape, const),
        pl.BlockSpec(w3b.shape, const), pl.BlockSpec(b3f.shape, const),
    ]
    args = [xb, w1b, b1f, w2b, b2f, w3b, b3f]

    training = bool(is_training)
    if training:
        key = jax.random.PRNGKey(seed)
        k1, k2 = jax.random.split(key)
        m1 = _make_dropout_mask(k1, (padded_batch, h1_dim), dropout1)
        m2 = _make_dropout_mask(k2, (padded_batch, h2_dim), dropout2)
        in_specs += [pl.BlockSpec((tb, h1_dim), row),
                     pl.BlockSpec((tb, h2_dim), row)]
        args += [m1, m2]

    kernel = functools.partial(mlp_kernel, training=training)

    flops = 2 * padded_batch * (xb.shape[1] * h1_dim
                                + h1_dim * h2_dim
                                + h2_dim * n_pad)
    bytes_accessed = (sum(int(a.size) * a.dtype.itemsize for a in args)
                      + padded_batch * n_pad * 4)

    out = pl.pallas_call(
        kernel,
        out_shape=jax.ShapeDtypeStruct((padded_batch, n_pad), jnp.float32),
        grid=grid,
        in_specs=in_specs,
        out_specs=pl.BlockSpec((tb, n_pad), row),
        compiler_params=pltpu.CompilerParams(
            dimension_semantics=("parallel",),
            vmem_limit_bytes=32 * 1024 * 1024),
        cost_estimate=pl.CostEstimate(flops=flops, transcendentals=0,
                                      bytes_accessed=bytes_accessed),
    )(*args)

    return out[:batch, :n_out]


def init_params(key, num_inputs, num_hiddens1, num_hiddens2, num_outputs):
    """Deterministic parameter init (shapes match nn.Linear; stored as (in, out))."""
    ks = jax.random.split(key, 6)

    def linear(kw, kb, fan_in, fan_out):
        bound = 1.0 / jnp.sqrt(fan_in)
        w = jax.random.uniform(kw, (fan_in, fan_out), jnp.float32, -bound, bound)
        b = jax.random.uniform(kb, (1, fan_out), jnp.float32, -bound, bound)
        return w, b

    w1, b1 = linear(ks[0], ks[1], num_inputs, num_hiddens1)
    w2, b2 = linear(ks[2], ks[3], num_hiddens1, num_hiddens2)
    w3, b3 = linear(ks[4], ks[5], num_hiddens2, num_outputs)
    return (w1, b1, w2, b2, w3, b3)


if __name__ == "__main__":
    # Small shapes consistent with the module: X of shape (B, 1, 16, 16) -> 256 inputs.
    batch = 16
    num_inputs, num_hiddens1, num_hiddens2, num_outputs = 256, 128, 128, 10
    dropout1, dropout2 = 0.2, 0.5

    key = jax.random.PRNGKey(0)
    k_x, k_p = jax.random.split(key)
    x = jax.random.normal(k_x, (batch, 1, 16, 16), dtype=jnp.float32)
    params = init_params(k_p, num_inputs, num_hiddens1, num_hiddens2, num_outputs)

    # Training-mode run (dropout active).
    out_train = jax.block_until_ready(
        net_forward(x, params, num_inputs=num_inputs,
                    dropout1=dropout1, dropout2=dropout2,
                    is_training=True, seed=42))
    assert out_train.shape == (batch, num_outputs)
    assert bool(jnp.all(jnp.isfinite(out_train)))

    # Eval-mode check against a plain-JAX reference using the same bf16 casts.
    out_eval = jax.block_until_ready(
        net_forward(x, params, num_inputs=num_inputs,
                    dropout1=dropout1, dropout2=dropout2,
                    is_training=False, seed=42))
    w1, b1, w2, b2, w3, b3 = params
    x2d = x.reshape((-1, num_inputs))
    ref = jnp.maximum(
        jnp.dot(x2d.astype(jnp.bfloat16), w1.astype(jnp.bfloat16),
                preferred_element_type=jnp.float32) + b1, 0.0)
    ref = jnp.maximum(
        jnp.dot(ref.astype(jnp.bfloat16), w2.astype(jnp.bfloat16),
                preferred_element_type=jnp.float32) + b2, 0.0)
    ref = jnp.dot(ref.astype(jnp.bfloat16), w3.astype(jnp.bfloat16),
                  preferred_element_type=jnp.float32) + b3
    assert jnp.allclose(out_eval, ref, atol=1e-2, rtol=1e-2)

    print("KERNEL_OK")
</pallas_src>

<mosaic_0001>
module attributes {stable_mosaic.version = 11 : i64} {
  func.func @mlp_kernel(%arg0: i32, %arg1: memref<16x256xbf16, #tpu.memory_space<vmem>>, %arg2: memref<256x128xbf16, #tpu.memory_space<vmem>>, %arg3: memref<1x128xf32, #tpu.memory_space<vmem>>, %arg4: memref<128x128xbf16, #tpu.memory_space<vmem>>, %arg5: memref<1x128xf32, #tpu.memory_space<vmem>>, %arg6: memref<128x128xbf16, #tpu.memory_space<vmem>>, %arg7: memref<1x128xf32, #tpu.memory_space<vmem>>, %arg8: memref<16x128xf32, #tpu.memory_space<vmem>>, %arg9: memref<16x128xf32, #tpu.memory_space<vmem>>, %arg10: memref<16x128xf32, #tpu.memory_space<vmem>>) attributes {dimension_semantics = [#tpu.dimension_semantics<parallel>], iteration_bounds = array<i64: 1>, scalar_prefetch = 0 : i64, scratch_operands = 0 : i64, tpu.core_type = #tpu.core_type<tc>, window_params = [{transform_indices = @transform_0, window_bounds = array<i64: 16, 256>}, {pipeline_mode = #tpu.pipeline_mode<synchronous>, transform_indices = @transform_1, window_bounds = array<i64: 256, 128>}, {pipeline_mode = #tpu.pipeline_mode<synchronous>, transform_indices = @transform_2, window_bounds = array<i64: 1, 128>}, {pipeline_mode = #tpu.pipeline_mode<synchronous>, transform_indices = @transform_3, window_bounds = array<i64: 128, 128>}, {pipeline_mode = #tpu.pipeline_mode<synchronous>, transform_indices = @transform_4, window_bounds = array<i64: 1, 128>}, {pipeline_mode = #tpu.pipeline_mode<synchronous>, transform_indices = @transform_5, window_bounds = array<i64: 128, 128>}, {pipeline_mode = #tpu.pipeline_mode<synchronous>, transform_indices = @transform_6, window_bounds = array<i64: 1, 128>}, {transform_indices = @transform_7, window_bounds = array<i64: 16, 128>}, {transform_indices = @transform_8, window_bounds = array<i64: 16, 128>}, {transform_indices = @transform_9, window_bounds = array<i64: 16, 128>}]} {
    %c0 = arith.constant 0 : index
    %c0_0 = arith.constant 0 : index
    %0 = vector.load %arg1[%c0, %c0_0] : memref<16x256xbf16, #tpu.memory_space<vmem>>, vector<16x256xbf16>
    %c0_1 = arith.constant 0 : index
    %c0_2 = arith.constant 0 : index
    %1 = vector.load %arg2[%c0_1, %c0_2] : memref<256x128xbf16, #tpu.memory_space<vmem>>, vector<256x128xbf16>
    %cst = arith.constant dense<0.000000e+00> : vector<16x128xf32>
    %2 = tpu.matmul %0, %1, %cst {dimension_numbers = #tpu.dot_dimension_numbers<[1], [0], [0], [1], [0, 0, 1, 1], [], []>} : vector<16x256xbf16>, vector<256x128xbf16>, vector<16x128xf32> -> vector<16x128xf32>
    %c0_3 = arith.constant 0 : index
    %c0_4 = arith.constant 0 : index
    %3 = vector.load %arg3[%c0_3, %c0_4] : memref<1x128xf32, #tpu.memory_space<vmem>>, vector<1x128xf32>
    %4 = vector.broadcast %3 : vector<1x128xf32> to vector<16x128xf32>
    %5 = arith.addf %2, %4 : vector<16x128xf32>
    %cst_5 = arith.constant 0.000000e+00 : f32
    %6 = vector.broadcast %cst_5 : f32 to vector<16x128xf32>
    %7 = arith.maximumf %5, %6 : vector<16x128xf32>
    %c0_6 = arith.constant 0 : index
    %c0_7 = arith.constant 0 : index
    %8 = vector.load %arg8[%c0_6, %c0_7] : memref<16x128xf32, #tpu.memory_space<vmem>>, vector<16x128xf32>
    %9 = arith.mulf %7, %8 : vector<16x128xf32>
    %10 = arith.truncf %9 : vector<16x128xf32> to vector<16x128xbf16>
    %c0_8 = arith.constant 0 : index
    %c0_9 = arith.constant 0 : index
    %11 = vector.load %arg4[%c0_8, %c0_9] : memref<128x128xbf16, #tpu.memory_space<vmem>>, vector<128x128xbf16>
    %cst_10 = arith.constant dense<0.000000e+00> : vector<16x128xf32>
    %12 = tpu.matmul %10, %11, %cst_10 {dimension_numbers = #tpu.dot_dimension_numbers<[1], [0], [0], [1], [0, 0, 1, 1], [], []>} : vector<16x128xbf16>, vector<128x128xbf16>, vector<16x128xf32> -> vector<16x128xf32>
    %c0_11 = arith.constant 0 : index
    %c0_12 = arith.constant 0 : index
    %13 = vector.load %arg5[%c0_11, %c0_12] : memref<1x128xf32, #tpu.memory_space<vmem>>, vector<1x128xf32>
    %14 = vector.broadcast %13 : vector<1x128xf32> to vector<16x128xf32>
    %15 = arith.addf %12, %14 : vector<16x128xf32>
    %cst_13 = arith.constant 0.000000e+00 : f32
    %16 = vector.broadcast %cst_13 : f32 to vector<16x128xf32>
    %17 = arith.maximumf %15, %16 : vector<16x128xf32>
    %c0_14 = arith.constant 0 : index
    %c0_15 = arith.constant 0 : index
    %18 = vector.load %arg9[%c0_14, %c0_15] : memref<16x128xf32, #tpu.memory_space<vmem>>, vector<16x128xf32>
    %19 = arith.mulf %17, %18 : vector<16x128xf32>
    %20 = arith.truncf %19 : vector<16x128xf32> to vector<16x128xbf16>
    %c0_16 = arith.constant 0 : index
    %c0_17 = arith.constant 0 : index
    %21 = vector.load %arg6[%c0_16, %c0_17] : memref<128x128xbf16, #tpu.memory_space<vmem>>, vector<128x128xbf16>
    %cst_18 = arith.constant dense<0.000000e+00> : vector<16x128xf32>
    %22 = tpu.matmul %20, %21, %cst_18 {dimension_numbers = #tpu.dot_dimension_numbers<[1], [0], [0], [1], [0, 0, 1, 1], [], []>} : vector<16x128xbf16>, vector<128x128xbf16>, vector<16x128xf32> -> vector<16x128xf32>
    %c0_19 = arith.constant 0 : index
    %c0_20 = arith.constant 0 : index
    %23 = vector.load %arg7[%c0_19, %c0_20] : memref<1x128xf32, #tpu.memory_space<vmem>>, vector<1x128xf32>
    %24 = vector.broadcast %23 : vector<1x128xf32> to vector<16x128xf32>
    %25 = arith.addf %22, %24 : vector<16x128xf32>
    %c0_21 = arith.constant 0 : index
    %c0_22 = arith.constant 0 : index
    %26 = vector.load %arg10[%c0_21, %c0_22] : memref<16x128xf32, #tpu.memory_space<vmem>>, vector<16x128xf32>
    tpu.vector_store %arg10[%c0_21, %c0_22], %25 {strides = array<i32>} : memref<16x128xf32, #tpu.memory_space<vmem>>, vector<16x128xf32>,
    return
  }
  func.func @transform_0(%arg0: i32) -> (i32, i32) {
    %c0_i32 = arith.constant 0 : i32
    %c0_i32_0 = arith.constant 0 : i32
    return %arg0, %c0_i32 : i32, i32
  }
  func.func @transform_1(%arg0: i32) -> (i32, i32) {
    %c0_i32 = arith.constant 0 : i32
    %c0_i32_0 = arith.constant 0 : i32
    %c0_i32_1 = arith.constant 0 : i32
    return %c0_i32, %c0_i32_0 : i32, i32
  }
  func.func @transform_2(%arg0: i32) -> (i32, i32) {
    %c0_i32 = arith.constant 0 : i32
    %c0_i32_0 = arith.constant 0 : i32
    %c0_i32_1 = arith.constant 0 : i32
    return %c0_i32, %c0_i32_0 : i32, i32
  }
  func.func @transform_3(%arg0: i32) -> (i32, i32) {
    %c0_i32 = arith.constant 0 : i32
    %c0_i32_0 = arith.constant 0 : i32
    %c0_i32_1 = arith.constant 0 : i32
    return %c0_i32, %c0_i32_0 : i32, i32
  }
  func.func @transform_4(%arg0: i32) -> (i32, i32) {
    %c0_i32 = arith.constant 0 : i32
    %c0_i32_0 = arith.constant 0 : i32
    %c0_i32_1 = arith.constant 0 : i32
    return %c0_i32, %c0_i32_0 : i32, i32
  }
  func.func @transform_5(%arg0: i32) -> (i32, i32) {
    %c0_i32 = arith.constant 0 : i32
    %c0_i32_0 = arith.constant 0 : i32
    %c0_i32_1 = arith.constant 0 : i32
    return %c0_i32, %c0_i32_0 : i32, i32
  }
  func.func @transform_6(%arg0: i32) -> (i32, i32) {
    %c0_i32 = arith.constant 0 : i32
    %c0_i32_0 = arith.constant 0 : i32
    %c0_i32_1 = arith.constant 0 : i32
    return %c0_i32, %c0_i32_0 : i32, i32
  }
  func.func @transform_7(%arg0: i32) -> (i32, i32) {
    %c0_i32 = arith.constant 0 : i32
    %c0_i32_0 = arith.constant 0 : i32
    return %arg0, %c0_i32 : i32, i32
  }
  func.func @transform_8(%arg0: i32) -> (i32, i32) {
    %c0_i32 = arith.constant 0 : i32
    %c0_i32_0 = arith.constant 0 : i32
    return %arg0, %c0_i32 : i32, i32
  }
  func.func @transform_9(%arg0: i32) -> (i32, i32) {
    %c0_i32 = arith.constant 0 : i32
    %c0_i32_0 = arith.constant 0 : i32
    return %arg0, %c0_i32 : i32, i32
  }
}

</mosaic_0001>

<bundles_post_ra>
// kernel: tpu_custom_call.1
= control target key start
LH: loop header
LB: loop body
LE: loop exit
PB: predicated region body
PF: predicated region fallthrough
CT: control target
= control target key end

     0   :  { %14 = vsyncpa [#allocation3], 0  ;;  %s1038_s0 = inlined_call_operand.hbm [shape: bf16[16,256], index: 0, kind: input, shape index: {}]   ;;  %s1039_s1 = inlined_call_operand.hbm [shape: bf16[256,128], index: 1, kind: input, shape index: {}]   ;;  %s1040_s2 = inlined_call_operand.vmem [shape: f32[1,128], index: 2, kind: input, shape index: {}]   ;;  %s1041_s3 = inlined_call_operand.hbm [shape: bf16[128,128], index: 3, kind: input, shape index: {}]   ;;  %s1042_s4 = inlined_call_operand.vmem [shape: f32[1,128], index: 4, kind: input, shape index: {}]   ;;  %s1043_s5 = inlined_call_operand.hbm [shape: bf16[128,128], index: 5, kind: input, shape index: {}]   ;;  %s1044_s6 = inlined_call_operand.vmem [shape: f32[1,128], index: 6, kind: input, shape index: {}]   ;;  %s1045_s7 = inlined_call_operand.vmem [shape: f32[16,128], index: 7, kind: input, shape index: {}]   ;;  %s1046_s8 = inlined_call_operand.hbm [shape: f32[16,128], index: 8, kind: input, shape index: {}]   ;;  %s1047_s9 = inlined_call_operand.hbm [shape: f32[16,128], index: 9, kind: output, shape index: {}]  }
   0x1   :  { %15 = vsyncpa [#allocation6], 0 }
   0x2   :  { %16 = vsyncpa [#allocation9], 0 }
   0x3   :  { %17 = vsyncpa [#allocation4], 0  ;;  %s853_s30 = smov [#allocation5]   ;;  %s713_s13 = scalar_lea.hbm %s1039_s1, 2048 }
   0x4   :  { %s35_s10 = sshll.u32 %s853_s30, 4  ;;  %p714_p0 = scmp.ne.s32.totalorder %s1039_s1, %s713_s13  ;;  %s36_s10 = int_to_ptr.vmem [resolvable:$true] %s35_s10 }
   0x5   :  { %p717_p1 = scmp.lt.u32.totalorder %s713_s13, %s1039_s1 }
   0x7   :  { %p719_p2 = pnand %p717_p1, %p714_p0 }
   0x9   :  { %722 = shalt.err (!%p719_p2)
}
   0xa   :  { %s723_s18 = scalar_lea.vmem %s36_s10, 2048  ;;  %p728_p4 = scmp.lt.s32.totalorder %s36_s10, %s36_s10 }
   0xb   :  { %p724_p3 = scmp.ne.s32.totalorder %s36_s10, %s723_s18  ;;  %p729_p5 = scmp.lt.s32.totalorder %s723_s18, %s723_s18 }
   0xd   :  { %p730_p6 = por %p729_p5, %p728_p4 }
   0xf   :  { %p731_p7 = pnand %p730_p6, %p724_p3 }
  0x11   :  { %734 = shalt.err (!%p731_p7)
}
  0x12   :  { %s854_s19 = smov 64   ;;  %s855_s20 = smov 4  }
  0x13   :  { %41 = dma.hbm_to_vmem [thread:$0]  %s1039_s1, 2048, %s36_s10, [#allocation6], %s854_s19, %s854_s19, %s855_s20  }
  0x14   :  { %s856_s23 = smov [#allocation8]   ;;  %s857_s25 = smov [#allocation2]  }
  0x15   :  { %s63_s24 = sshll.u32 %s856_s23, 4  ;;  %s23_s26 = sshll.u32 %s857_s25, 4  ;;  %s64_s24 = int_to_ptr.vmem [resolvable:$true] %s63_s24  ;;  %s24_s26 = int_to_ptr.vmem [resolvable:$true] %s23_s26 }
  0x16   :  { %s735_s29 = scalar_lea.hbm %s1043_s5, 1024 }
  0x17   :  { %p736_p8 = scmp.ne.s32.totalorder %s1043_s5, %s735_s29  ;;  %p739_p9 = scmp.lt.u32.totalorder %s735_s29, %s1043_s5 }
  0x19   :  { %p741_p10 = pnand %p739_p9, %p736_p8 }
  0x1b   :  { %744 = shalt.err (!%p741_p10)
}
  0x1c   :  { %s745_s1 = scalar_lea.vmem %s64_s24, 1024  ;;  %p750_p12 = scmp.lt.s32.totalorder %s64_s24, %s64_s24 }
  0x1d   :  { %p746_p11 = scmp.ne.s32.totalorder %s64_s24, %s745_s1  ;;  %p751_p13 = scmp.lt.s32.totalorder %s745_s1, %s745_s1 }
  0x1f   :  { %p752_p0 = por %p751_p13, %p750_p12 }
  0x21   :  { %p753_p1 = pnand %p752_p0, %p746_p11 }
  0x23   :  { %756 = shalt.err (!%p753_p1)
}
  0x24   :  { %69 = dma.hbm_to_vmem [thread:$0]  %s1043_s5, 1024, %s64_s24, [#allocation9], %s854_s19, %s854_s19, %s855_s20  }
  0x25   :  { %s757_s17 = scalar_lea.hbm %s1038_s0, 256 }
  0x26   :  { %p758_p2 = scmp.ne.s32.totalorder %s1038_s0, %s757_s17  ;;  %p761_p3 = scmp.lt.u32.totalorder %s757_s17, %s1038_s0 }
  0x28   :  { %p763_p4 = pnand %p761_p3, %p758_p2 }
  0x2a   :  { %766 = shalt.err (!%p763_p4)
}
  0x2b   :  { %s767_s25 = scalar_lea.vmem %s24_s26, 256  ;;  %p772_p6 = scmp.lt.s32.totalorder %s24_s26, %s24_s26 }
  0x2c   :  { %p768_p5 = scmp.ne.s32.totalorder %s24_s26, %s767_s25  ;;  %p773_p7 = scmp.lt.s32.totalorder %s767_s25, %s767_s25 }
  0x2e   :  { %p774_p8 = por %p773_p7, %p772_p6 }
  0x30   :  { %p775_p9 = pnand %p774_p8, %p768_p5 }
  0x32   :  { %778 = shalt.err (!%p775_p9)
}
  0x33   :  { %s858_s5 = smov 128   ;;  %s859_s24 = smov 8  }
  0x34   :  { %29 = dma.hbm_to_vmem [thread:$0]  %s1038_s0, 256, %s24_s26, [#allocation3], %s858_s5, %s858_s5, %s859_s24  }
  0x35   :  { %s860_s29 = smov [#allocation7]   ;;  %s861_s11 = smov [#allocation10]  }
  0x36   :  { %s49_s30 = sshll.u32 %s860_s29, 4  ;;  %s79_s12 = sshll.u32 %s861_s11, 4  ;;  %s50_s30 = int_to_ptr.vmem [resolvable:$true] %s49_s30  ;;  %s80_s12 = int_to_ptr.vmem [resolvable:$true] %s79_s12 }
  0x37   :  { %s779_s10 = scalar_lea.hbm %s1041_s3, 1024 }
  0x38   :  { %p780_p10 = scmp.ne.s32.totalorder %s1041_s3, %s779_s10  ;;  %p783_p11 = scmp.lt.u32.totalorder %s779_s10, %s1041_s3 }
  0x3a   :  { %p785_p12 = pnand %p783_p11, %p780_p10 }
  0x3c   :  { %788 = shalt.err (!%p785_p12)
}
  0x3d   :  { %s789_s0 = scalar_lea.vmem %s50_s30, 1024  ;;  %p794_p0 = scmp.lt.s32.totalorder %s50_s30, %s50_s30 }
  0x3e   :  { %p790_p13 = scmp.ne.s32.totalorder %s50_s30, %s789_s0  ;;  %p795_p1 = scmp.lt.s32.totalorder %s789_s0, %s789_s0 }
  0x40   :  { %p796_p2 = por %p795_p1, %p794_p0 }
  0x42   :  { %p797_p3 = pnand %p796_p2, %p790_p13 }
  0x44   :  { %800 = shalt.err (!%p797_p3)
}
  0x45   :  { %55 = dma.hbm_to_vmem [thread:$0]  %s1041_s3, 1024, %s50_s30, [#allocation6], %s854_s19, %s854_s19, %s855_s20  }
  0x46   :  { %s801_s23 = scalar_lea.hbm %s1046_s8, 256 }
  0x47   :  { %p802_p4 = scmp.ne.s32.totalorder %s1046_s8, %s801_s23  ;;  %p805_p5 = scmp.lt.u32.totalorder %s801_s23, %s1046_s8 }
  0x49   :  { %p807_p6 = pnand %p805_p5, %p802_p4 }
  0x4b   :  { %810 = shalt.err (!%p807_p6)
}
  0x4c   :  { %s811_s11 = scalar_lea.vmem %s80_s12, 256  ;;  %p816_p8 = scmp.lt.s32.totalorder %s80_s12, %s80_s12 }
  0x4d   :  { %p812_p7 = scmp.ne.s32.totalorder %s80_s12, %s811_s11  ;;  %p817_p9 = scmp.lt.s32.totalorder %s811_s11, %s811_s11 }
  0x4f   :  { %p818_p10 = por %p817_p9, %p816_p8 }
  0x51   :  { %p819_p11 = pnand %p818_p10, %p812_p7 }
  0x53   :  { %822 = shalt.err (!%p819_p11)
}
  0x54   :  { %85 = dma.hbm_to_vmem [thread:$0]  %s1046_s8, 256, %s80_s12, [#allocation9], %s858_s5, %s858_s5, %s859_s24  }
  0x55   :  { %845 = dma.done.wait [#allocation3], 256  }
  0x56   :  { %846 = vsyncadd [#allocation3], 4294967040 }
  0x57   :  { %847 = dma.done.wait [#allocation6], 3072  }
  0x58   :  { %848 = vsyncadd [#allocation6], 4294964224 }
  0x59   :  { %849 = dma.done.wait [#allocation9], 1280  }
  0x5a   :  { %850 = vsyncadd [#allocation9], 4294966016  ;;  %v862_v0 = vmov 0.0   ;;  %v678_v1 = vld [vmem:[#allocation5 + $0x40] sm:$0xff]   ;;  %v680_v3 = vld [vmem:[#allocation5 + $0x48] sm:$0xff]   ;;  %vm863_vm0 = vmmov 0  }
  0x5b   :  { %626 = vmatprep.subr.bf16.mxu1 %v862_v0  ;;  %v679_v2 = vld [vmem:[#allocation5] sm:$0xff]   ;;  %586 = vmatprep.subr.bf16.mxu0 %v678_v1  ;;  %v681_v4 = vld [vmem:[#allocation5 + $0x8] sm:$0xff]   ;;  %v682_v5 = vld [vmem:[#allocation5 + $0x50] sm:$0xff]  }
  0x5c   :  { %587 = vmatpush3.bf16.msra.mxu0 %v679_v2  ;;  %v683_v6 = vld [vmem:[#allocation5 + $0x10] sm:$0xff]   ;;  %v684_v7 = vld [vmem:[#allocation5 + $0x58] sm:$0xff]   ;;  %v686_v9 = vld [vmem:[#allocation5 + $0x60] sm:$0xff]   ;;  %642 = vmatprep.mubr.msk.bf16.mxu1 %vm863_vm0, %v862_v0 }
  0x5d   :  { %588 = vmatprep.subr.bf16.mxu0 %v680_v3  ;;  %v685_v8 = vld [vmem:[#allocation5 + $0x18] sm:$0xff]   ;;  %v687_v10 = vld [vmem:[#allocation5 + $0x20] sm:$0xff]   ;;  %v688_v11 = vld [vmem:[#allocation5 + $0x68] sm:$0xff]  }
  0x5e   :  { %v689_v12 = vld [vmem:[#allocation5 + $0x28] sm:$0xff]   ;;  %v696_v13 = vld [vmem:[#allocation2 + $0x4] ss:$8 sps:$4 sm:$0xff]   ;;  %v697_v14 = vld [vmem:[#allocation7] sm:$0xff]  }
  0x5f   :  { %v690_v15 = vld [vmem:[#allocation5 + $0x70] sm:$0xff]   ;;  %281 = vmatprep.mubr.bf16.mxu0 %v696_v13  ;;  %627 = vmatpush3.bf16.msra.mxu1 %v697_v14  ;;  %v698_v16 = vld [vmem:[#allocation7 + $0x8] sm:$0xff]   ;;  %v692_v18 = vld [vmem:[#allocation5 + $0x78] sm:$0xff]  }
  0x60   :  { %589 = vmatpush3.bf16.msra.mxu0 %v681_v4  ;;  %v691_v17 = vld [vmem:[#allocation5 + $0x30] sm:$0xff]   ;;  %628 = vmatprep.subr.bf16.mxu1 %v862_v0  ;;  %v693_v20 = vld [vmem:[#allocation5 + $0x38] sm:$0xff]   ;;  %v701_v23 = vld [vmem:[#allocation7 + $0x20] sm:$0xff]  }
  0x61   :  { %590 = vmatprep.subr.bf16.mxu0 %v682_v5  ;;  %v699_v19 = vld [vmem:[#allocation7 + $0x10] sm:$0xff]   ;;  %v700_v21 = vld [vmem:[#allocation7 + $0x18] sm:$0xff]   ;;  %v702_v24 = vld [vmem:[#allocation7 + $0x28] sm:$0xff]  }
  0x62   :  { %v694_v22 = vld [vmem:[#allocation2] ss:$8 sps:$4 sm:$0xff]   ;;  %v705_v27 = vld [vmem:[#allocation8] sm:$0xff]   ;;  %v706_v28 = vld [vmem:[#allocation8 + $0x8] sm:$0xff]  }
  0x63   :  { %629 = vmatpush3.bf16.msra.mxu1 %v698_v16  ;;  %v703_v25 = vld [vmem:[#allocation7 + $0x30] sm:$0xff]   ;;  %v704_v26 = vld [vmem:[#allocation7 + $0x38] sm:$0xff]   ;;  %v709_v31 = vld [vmem:[#allocation8 + $0x20] sm:$0xff]  }
  0x64   :  { %591 = vmatpush3.bf16.msra.mxu0 %v683_v6  ;;  %630 = vmatprep.subr.bf16.mxu1 %v862_v0  ;;  %v707_v29 = vld [vmem:[#allocation8 + $0x10] sm:$0xff]   ;;  %v708_v30 = vld [vmem:[#allocation8 + $0x18] sm:$0xff]   ;;  %v710_v48 = vld [vmem:[#allocation8 + $0x28] sm:$0xff]  }
  0x65   :  { %592 = vmatprep.subr.bf16.mxu0 %v684_v7  ;;  %v549_v33 = vld [vmem:[%s1040_s2] ss:$0 sm:$0xff]  ;;  %v293_v43 = vld [vmem:[%s1045_s7 + $0x8] sm:$0xff]  ;;  %v411_v59 = vld [vmem:[#allocation10] sm:$0xff] }
  0x66   :  { %v292_v42 = vld [vmem:[%s1045_s7] sm:$0xff]  ;;  %v712_v50 = vld [vmem:[#allocation8 + $0x38] sm:$0xff]   ;;  %v412_v60 = vld [vmem:[#allocation10 + $0x8] sm:$0xff] }
  0x67   :  { %631 = vmatpush3.bf16.msra.mxu1 %v699_v19  ;;  %v711_v49 = vld [vmem:[#allocation8 + $0x30] sm:$0xff]  }
  0x68   :  { %593 = vmatpush3.bf16.msra.mxu0 %v685_v8  ;;  %632 = vmatprep.subr.bf16.mxu1 %v862_v0  ;;  %v568_v51 = vld [vmem:[%s1042_s4] ss:$0 sm:$0xff]  ;;  %s864_s4 = smov [#allocation11]  }
  0x69   :  { %594 = vmatprep.subr.bf16.mxu0 %v686_v9  ;;  %s535_s15 = sshll.u32 %s864_s4, 4  ;;  %s536_s15 = int_to_ptr.vmem [resolvable:$true] %s535_s15 }
  0x6a   :  { %s823_s16 = scalar_lea.vmem %s536_s15, 256  ;;  %p828_p13 = scmp.lt.s32.totalorder %s536_s15, %s536_s15 }
  0x6b   :  { %633 = vmatpush3.bf16.msra.mxu1 %v700_v21  ;;  %p824_p12 = scmp.ne.s32.totalorder %s536_s15, %s823_s16  ;;  %p829_p0 = scmp.lt.s32.totalorder %s823_s16, %s823_s16 }
  0x6c   :  { %595 = vmatpush3.bf16.msra.mxu0 %v687_v10  ;;  %634 = vmatprep.subr.bf16.mxu1 %v862_v0 }
  0x6d   :  { %596 = vmatprep.subr.bf16.mxu0 %v688_v11  ;;  %p830_p1 = por %p829_p0, %p828_p13 }
  0x6f   :  { %635 = vmatpush3.bf16.msra.mxu1 %v701_v23  ;;  %p831_p2 = pnand %p830_p1, %p824_p12 }
  0x70   :  { %597 = vmatpush3.bf16.msra.mxu0 %v689_v12  ;;  %636 = vmatprep.subr.bf16.mxu1 %v862_v0 }
  0x71   :  { %598 = vmatprep.subr.bf16.mxu0 %v690_v15 }
  0x73   :  { %637 = vmatpush3.bf16.msra.mxu1 %v702_v24 }
  0x74   :  { %599 = vmatpush3.bf16.msra.mxu0 %v691_v17  ;;  %638 = vmatprep.subr.bf16.mxu1 %v862_v0 }
  0x75   :  { %600 = vmatprep.subr.bf16.mxu0 %v692_v18 }
  0x77   :  { %639 = vmatpush3.bf16.msra.mxu1 %v703_v25 }
  0x78   :  { %601 = vmatpush3.bf16.msra.mxu0 %v693_v20  ;;  %640 = vmatprep.subr.bf16.mxu1 %v862_v0 }
  0x79   :  { %646 = vmatprep.subr.bf16.mxu0 %v862_v0 }
  0x7b   :  { %282 = vmatmul.mubr.bf16.vlgmr.msra.gmra.mrb[0].mxu0 %v694_v22  ;;  %641 = vmatpush3.bf16.msra.mxu1 %v704_v26 }
  0x7c   :  { %662 = vmatprep.mubr.msk.bf16.mxu0 %vm863_vm0, %v862_v0  ;;  %647 = vmatpush3.bf16.msra.mxu0 %v705_v27 }
  0x7d   :  { %648 = vmatprep.subr.bf16.mxu0 %v862_v0 }
  0x80   :  { %649 = vmatpush3.bf16.msra.mxu0 %v706_v28 }
  0x81   :  { %650 = vmatprep.subr.bf16.mxu0 %v862_v0 }
  0x84   :  { %651 = vmatpush3.bf16.msra.mxu0 %v707_v29 }
  0x85   :  { %652 = vmatprep.subr.bf16.mxu0 %v862_v0 }
  0x88   :  { %653 = vmatpush3.bf16.msra.mxu0 %v708_v30 }
  0x89   :  { %654 = vmatprep.subr.bf16.mxu0 %v862_v0 }
  0x8c   :  { %655 = vmatpush3.bf16.msra.mxu0 %v709_v31 }
  0x8d   :  { %656 = vmatprep.subr.bf16.mxu0 %v862_v0 }
  0x90   :  { %657 = vmatpush3.bf16.msra.mxu0 %v710_v48 }
  0x91   :  { %658 = vmatprep.subr.bf16.mxu0 %v862_v0 }
  0x94   :  { %659 = vmatpush3.bf16.msra.mxu0 %v711_v49 }
  0x95   :  { %660 = vmatprep.subr.bf16.mxu0 %v862_v0  ;;  %v577_v0 = vld [vmem:[%s1044_s6] ss:$0 sm:$0xff] }
  0x98   :  { %661 = vmatpush3.bf16.msra.mxu0 %v712_v50 }
 0x14e   :  { %v602_v32 = vpop.f32.mrb[0].mxu0 }
 0x14f   :  { %v603_v34 = vpop.f32.mrb[1].mxu0 }
 0x150   :  { %v604_v35 = vadd.f32 %v603_v34, %v602_v32  ;;  %v605_v36 = vpop.f32.mrb[2].mxu0 }
 0x151   :  { %v606_v37 = vpop.f32.mrb[3].mxu0 }
 0x152   :  { %v284_v38 = vadd.f32 %v604_v35, %v549_v33  ;;  %v607_v39 = vadd.f32 %v606_v37, %v605_v36 }
 0x154   :  { %v290_v40 = vmax.f32 %v284_v38, 0.0  ;;  %v287_v41 = vadd.f32 %v607_v39, %v549_v33 }
 0x156   :  { %v291_v44 = vmax.f32 %v287_v41, 0.0  ;;  %v294_v45 = vmul.f32 %v292_v42, %v290_v40 }
 0x158   :  { %v295_v46 = vmul.f32 %v293_v43, %v291_v44 }
 0x15a   :  { %v296_v47 = vpack.c.bf16 %v295_v46, %v294_v45 }
 0x15c   :  { %643 = vmatmul.mubr.bf16.vlgmr.msra.gmra.mrb[0].mxu1 %v296_v47 }
 0x22f   :  { %v402_v52 = vpop.f32.mrb[0].mxu1 }
 0x230   :  { %v403_v53 = vadd.f32 %v568_v51, %v402_v52  ;;  %v644_v54 = vpop.f32.mrb[1].mxu1 }
 0x231   :  { %v405_v55 = vpop.f32.mrb[2].mxu1 }
 0x232   :  { %v409_v56 = vmax.f32 %v403_v53, 0.0  ;;  %v406_v57 = vadd.f32 %v568_v51, %v405_v55  ;;  %v645_v58 = vpop.f32.mrb[3].mxu1 }
 0x234   :  { %v410_v61 = vmax.f32 %v406_v57, 0.0  ;;  %v413_v62 = vmul.f32 %v411_v59, %v409_v56 }
 0x236   :  { %v414_v63 = vmul.f32 %v412_v60, %v410_v61 }
 0x238   :  { %v415_v1 = vpack.c.bf16 %v414_v63, %v413_v62 }
 0x23a   :  { %663 = vmatmul.mubr.bf16.vlgmr.msra.gmra.mrb[4].mxu0 %v415_v1 }
 0x30d   :  { %v521_v2 = vpop.f32.mrb[4].mxu0 }
 0x30e   :  { %v522_v3 = vadd.f32 %v577_v0, %v521_v2  ;;  %v664_v4 = vpop.f32.mrb[5].mxu0 }
 0x30f   :  { %v524_v5 = vpop.f32.mrb[6].mxu0 }
 0x310   :  { %528 = vst [vmem:[#allocation11] sm:$0xff] %v522_v3  ;;  %v525_v6 = vadd.f32 %v577_v0, %v524_v5  ;;  %v665_v7 = vpop.f32.mrb[7].mxu0 }
 0x312   :  { %529 = vst [vmem:[#allocation11 + $0x8] sm:$0xff] %v525_v6 }
 0x313   :  { %834 = shalt.err (!%p831_p2)
}
 0x314   :  { %s835_s0 = scalar_lea.hbm %s1047_s9, 256 }
 0x315   :  { %p836_p3 = scmp.ne.s32.totalorder %s1047_s9, %s835_s0  ;;  %p839_p4 = scmp.lt.u32.totalorder %s835_s0, %s1047_s9 }
 0x317   :  { %p841_p5 = pnand %p839_p4, %p836_p3 }
 0x319   :  { %844 = shalt.err (!%p841_p5)
}
 0x31a   :  { %541 = dma.vmem_to_hbm [thread:$0]  %s536_s15, 256, %s1047_s9, [#allocation4], %s858_s5, %s858_s5, %s859_s24  }
 0x31b   :  { %851 = dma.done.wait [#allocation4], 256  }
 0x31c   :  { %852 = vsyncadd [#allocation4], 4294967040 }
 0x31d   :  { %545 = vsyncpa [#allocation3], 1 }
 0x31e   :  { %546 = vsyncpa [#allocation6], 1 }
 0x31f   :  { %547 = vsyncpa [#allocation9], 1 }
 0x320   :  { %548 = vsyncpa [#allocation4], 1 }

</bundles_post_ra>
